<compile_context>
chip_gen: v6e
topology: v6e:2x2x1
jax: 0.10.0
libtpu: 0.0.40
codegen_flags: <defaults>
</compile_context>

<pallas_src>
import functools

import jax
import jax.numpy as jnp
from jax.experimental import pallas as pl
from jax.experimental.pallas import tpu as pltpu

_OUT_SUB = 8      # sublanes in the per-tile partial-sum slab
_OUT_LANES = 128  # lanes   in the per-tile partial-sum slab (lane-dense store)
_LANE = 128       # VMEM lane width (labels (tile_n, 1) block pads to this)


def _loss_tile_kernel(out_ref, lab_ref, part_ref, *,
                      inv_t, need_pos, need_neg, n_total, tile_n):
    """Per-tile partial sums.

    part_ref[0, 0, 0] <- sum_i [ logsumexp(x_i) - x_i[label_i] ]   (CE numerator)
    part_ref[0, 0, 1] <- sum_i logsumexp( x_i / T)   (only if need_pos)
    part_ref[0, 0, 2] <- sum_i logsumexp(-x_i / T)   (only if need_neg)
    """
    i = pl.program_id(0)
    x = out_ref[...].astype(jnp.float32)            # (tile_n, C) cast in VMEM
    tn, c = x.shape
    labels = lab_ref[...]                           # (tile_n, 1) int32

    # Row-validity mask for a possibly padded last tile.  Static gate: the
    # tile chooser prefers tile_n | N, so the hot path is usually mask-free.
    if n_total % tile_n != 0:
        row = jax.lax.broadcasted_iota(jnp.int32, (tn, 1), 0) + i * tile_n
        valid = row < n_total                       # (tile_n, 1) bool
        # Mask x BEFORE any exp/log so padded-row garbage cannot propagate
        # as NaN/Inf through the reductions (ordering is load-bearing).
        x = jnp.where(valid, x, 0.0)
        row_mask = valid.astype(jnp.float32)
    else:
        row_mask = None

    # ---- cross-entropy pieces (stable log-sum-exp) ------------------------
    m = jnp.max(x, axis=1, keepdims=True)           # (tile_n, 1)
    d = x - m                                       # (tile_n, C)
    lse = m + jnp.log(jnp.sum(jnp.exp(d), axis=1, keepdims=True))

    cls_idx = jax.lax.broadcasted_iota(jnp.int32, (tn, c), 1)
    label_logit = jnp.sum(jnp.where(cls_idx == labels, x, 0.0),
                          axis=1, keepdims=True)    # no one-hot cast/multiply

    ce_rows = lse - label_logit                     # (tile_n, 1)
    if row_mask is not None:
        ce_rows = ce_rows * row_mask
    ce_sum = jnp.sum(ce_rows)

    # ---- logsumexp(x / T): reuse m and (x - m); reuse lse when T == 1 -----
    pos_sum = None
    if need_pos:
        if inv_t == 1.0:
            lse_pos = lse                           # no second exp pass
        else:
            lse_pos = m * inv_t + jnp.log(
                jnp.sum(jnp.exp(d * inv_t), axis=1, keepdims=True))
        if row_mask is not None:
            lse_pos = lse_pos * row_mask
        pos_sum = jnp.sum(lse_pos)

    # ---- logsumexp(-x / T): one extra min reduction, no extra divides -----
    neg_sum = None
    if need_neg:
        mn = jnp.min(x, axis=1, keepdims=True)
        lse_neg = (-mn) * inv_t + jnp.log(
            jnp.sum(jnp.exp((mn - x) * inv_t), axis=1, keepdims=True))
        if row_mask is not None:
            lse_neg = lse_neg * row_mask
        neg_sum = jnp.sum(lse_neg)

    # ---- single lane-dense (1, 8, 128) partial-sum store ------------------
    sub = jax.lax.broadcasted_iota(jnp.int32, (1, _OUT_SUB, _OUT_LANES), 1)
    lane = jax.lax.broadcasted_iota(jnp.int32, (1, _OUT_SUB, _OUT_LANES), 2)
    row0 = sub == 0
    out = jnp.where(row0 & (lane == 0), ce_sum, jnp.float32(0.0))
    if need_pos:
        out = out + jnp.where(row0 & (lane == 1), pos_sum, 0.0)
    if need_neg:
        out = out + jnp.where(row0 & (lane == 2), neg_sum, 0.0)
    part_ref[...] = out


def _vmem_limit_bytes():
    """Per-generation scoped VMEM limit: ~75% of physical capacity.

    v7x: 64 MiB physical -> ~48 MiB limit; v5e/v6e: 128 MiB -> clamped 100 MiB.
    Falls back to the v7x-safe 48 MiB if the hardware query is unavailable.
    """
    try:
        cap = int(pltpu.get_tpu_info().vmem_capacity_bytes)
    except Exception:
        cap = 64 * 1024 * 1024
    limit = int(cap * 0.75)
    return max(32 * 1024 * 1024, min(limit, 100 * 1024 * 1024))


def _choose_tile_n(n, c, itemsize, vmem_limit, need_extra_lse):
    """Biggest batch tile whose full VMEM footprint fits the scoped limit.

    Per-row VMEM cost accounts for:
      * 2x double-buffered native-dtype logits block,
      * ~4 tile-sized f32 intermediates (x.astype, x-m, exp, select temp),
        +1 when a second tempered exp pass is needed,
      * 2x double-buffered labels block (lane-padded to 128 int32 lanes).
    Also forces >= 2 grid steps (v7x dual-TC sharding) and prefers a tile_n
    that divides N evenly so the steady state stays mask-free.
    """
    f32_tiles = 5 if need_extra_lse else 4
    per_row = 2 * c * itemsize + f32_tiles * 4 * c + 2 * _LANE * 4
    budget = int(vmem_limit * 0.85)
    tile = max(8, budget // max(per_row, 1))
    tile = min(tile, n)
    if n >= 16:
        # At least two tiles so the "parallel" axis can shard across both
        # v7x TensorCores even when all of N would fit in one tile.
        tile = min(tile, (n + 1) // 2)
    if tile != n:
        tile = max(8, (tile // 8) * 8)
        divs = [t for t in range(8, tile + 1, 8) if n % t == 0]
        if divs:
            tile = divs[-1]          # mask-free hot path
    return tile


def _reduce_call(outputs, labels_2d, *, inv_t, need_pos, need_neg, tile_n=None):
    n, c = outputs.shape
    vmem_limit = _vmem_limit_bytes()
    if tile_n is None:
        need_extra = (need_pos and inv_t != 1.0) or need_neg
        tile_n = _choose_tile_n(n, c, jnp.dtype(outputs.dtype).itemsize,
                                vmem_limit, need_extra)
    grid_n = pl.cdiv(n, tile_n)

    kernel = functools.partial(
        _loss_tile_kernel, inv_t=inv_t, need_pos=need_pos, need_neg=need_neg,
        n_total=n, tile_n=tile_n)

    partials = pl.pallas_call(
        kernel,
        out_shape=jax.ShapeDtypeStruct((grid_n, _OUT_SUB, _OUT_LANES),
                                       jnp.float32),
        grid=(grid_n,),
        in_specs=[
            pl.BlockSpec((tile_n, c), lambda i: (i, 0)),
            # NOTE: kept as (tile_n, 1) for lowering safety; its lane-padded
            # footprint is charged to the tile budget in _choose_tile_n.
            pl.BlockSpec((tile_n, 1), lambda i: (i, 0)),
        ],
        out_specs=pl.BlockSpec((1, _OUT_SUB, _OUT_LANES),
                               lambda i: (i, 0, 0)),
        compiler_params=pltpu.CompilerParams(
            dimension_semantics=("parallel",),   # independent tiles -> 2 TCs on v7x
            vmem_limit_bytes=vmem_limit,
        ),
    )(outputs, labels_2d)

    sums = jnp.sum(partials, axis=(0, 1))        # (128,) -> lanes 0..2 used
    return sums[0], sums[1], sums[2]


def custom_loss(outputs, labels, *, criterion=None,
                beta=1.0, UM_ce=0.5, temperature=1.0, alpha=0.1,
                UM_e=0.05, UMe=True, UM=0.2, tile_n=None):
    """JAX/Pallas equivalent of CustomLoss.forward(outputs, labels).

    Note: criterion / temperature are baked in as Python statics (inv_t,
    need_pos/need_neg), so each distinct value triggers a recompile.
    """
    n, _ = outputs.shape
    labels_2d = labels.astype(jnp.int32).reshape(n, 1)

    need_pos = criterion == 'EnergyLoss'
    need_neg = criterion == 'LogEnergyLoss'

    ce_sum, lse_pos_sum, lse_neg_sum = _reduce_call(
        outputs, labels_2d, inv_t=1.0 / float(temperature),
        need_pos=need_pos, need_neg=need_neg, tile_n=tile_n)

    ce_mean = ce_sum / n                         # nn.CrossEntropyLoss (mean)
    loss = beta * ce_mean
    loss = jnp.abs(loss - UM_ce) + UM_ce

    if criterion == 'EnergyLoss':
        energy = alpha / (temperature * (lse_pos_sum / n))
        energy = jnp.abs(energy - UM_e) + UM_e
        loss = jnp.abs(loss - energy) + energy if UMe else loss + energy
    if criterion == 'LogEnergyLoss':
        energy = alpha / (temperature * (lse_neg_sum / n))
        loss = loss + energy

    loss = jnp.abs(loss - UM) + UM
    return loss


def _reference_loss(outputs, labels, *, criterion, beta, UM_ce, temperature,
                    alpha, UM_e, UMe, UM):
    """Pure-JAX reference for correctness checking."""
    outputs = outputs.astype(jnp.float32)
    lse = jax.scipy.special.logsumexp(outputs, axis=1)
    ll = outputs[jnp.arange(outputs.shape[0]), labels]
    ce = jnp.mean(lse - ll)
    loss = beta * ce
    loss = jnp.abs(loss - UM_ce) + UM_ce
    if criterion == 'EnergyLoss':
        energy = alpha / (temperature * jnp.mean(
            jax.scipy.special.logsumexp(outputs / temperature, axis=1)))
        energy = jnp.abs(energy - UM_e) + UM_e
        loss = jnp.abs(loss - energy) + energy if UMe else loss + energy
    if criterion == 'LogEnergyLoss':
        energy = alpha / (temperature * jnp.mean(
            jax.scipy.special.logsumexp(-outputs / temperature, axis=1)))
        loss = loss + energy
    loss = jnp.abs(loss - UM) + UM
    return loss


if __name__ == "__main__":
    key = jax.random.PRNGKey(0)
    k_out, k_lab = jax.random.split(key)

    # Small, lane-dense example: batch=24, num_classes=128.
    N, C = 24, 128
    outputs = jax.random.normal(k_out, (N, C), dtype=jnp.float32)
    labels = jax.random.randint(k_lab, (N,), 0, C, dtype=jnp.int32)

    # 1) default chooser (multi-tile, mask-free, grid_n >= 2), all criteria;
    #    includes temperature=1 (lse-reuse path) and temperature=2.
    for temp in (1.0, 2.0):
        hp = dict(beta=1.0, UM_ce=0.5, temperature=temp, alpha=0.1,
                  UM_e=0.05, UMe=True, UM=0.2)
        for crit in (None, 'EnergyLoss', 'LogEnergyLoss'):
            loss = jax.block_until_ready(
                custom_loss(outputs, labels, criterion=crit, **hp))
            ref = jax.block_until_ready(
                _reference_loss(outputs, labels, criterion=crit, **hp))
            assert jnp.allclose(loss, ref, rtol=1e-5, atol=1e-5), \
                (crit, temp, loss, ref)

    # 2) multi-tile + ragged-last-tile path (forces tile_n=8 over N=20).
    hparams = dict(beta=1.0, UM_ce=0.5, temperature=2.0, alpha=0.1,
                   UM_e=0.05, UMe=True, UM=0.2)
    outputs2 = outputs[:20]
    labels2 = labels[:20]
    for crit in (None, 'EnergyLoss', 'LogEnergyLoss'):
        loss = jax.block_until_ready(
            custom_loss(outputs2, labels2, criterion=crit, tile_n=8, **hparams))
        ref = jax.block_until_ready(
            _reference_loss(outputs2, labels2, criterion=crit, **hparams))
        assert jnp.allclose(loss, ref, rtol=1e-5, atol=1e-5), (crit, loss, ref)

    print("KERNEL_OK")
</pallas_src>

<mosaic_0001>
module attributes {stable_mosaic.version = 11 : i64} {
  func.func @_loss_tile_kernel(%arg0: i32, %arg1: memref<8x128xf32, #tpu.memory_space<vmem>>, %arg2: memref<8x1xi32, #tpu.memory_space<vmem>>, %arg3: memref<1x8x128xf32, #tpu.memory_space<vmem>>) attributes {dimension_semantics = [#tpu.dimension_semantics<parallel>], iteration_bounds = array<i64: 3>, scalar_prefetch = 0 : i64, scratch_operands = 0 : i64, tpu.core_type = #tpu.core_type<tc>, window_params = [{transform_indices = @transform_0, window_bounds = array<i64: 8, 128>}, {transform_indices = @transform_1, window_bounds = array<i64: 8, 1>}, {transform_indices = @transform_2, window_bounds = array<i64: 1, 8, 128>}]} {
    %c0 = arith.constant 0 : index
    %c0_0 = arith.constant 0 : index
    %0 = vector.load %arg1[%c0, %c0_0] : memref<8x128xf32, #tpu.memory_space<vmem>>, vector<8x128xf32>
    %c0_1 = arith.constant 0 : index
    %c0_2 = arith.constant 0 : index
    %1 = vector.load %arg2[%c0_1, %c0_2] : memref<8x1xi32, #tpu.memory_space<vmem>>, vector<8x1xi32>
    %cst = arith.constant dense<0xFF800000> : vector<8xf32>
    %2 = vector.multi_reduction <maximumf>, %0, %cst [1] : vector<8x128xf32> to vector<8xf32>
    %3 = vector.shape_cast %2 : vector<8xf32> to vector<8x1xf32>
    %4 = vector.broadcast %3 : vector<8x1xf32> to vector<8x128xf32>
    %5 = arith.subf %0, %4 : vector<8x128xf32>
    %6 = math.exp %5 : vector<8x128xf32>
    %cst_3 = arith.constant dense<0.000000e+00> : vector<8xf32>
    %7 = vector.multi_reduction <add>, %6, %cst_3 [1] : vector<8x128xf32> to vector<8xf32>
    %8 = vector.shape_cast %7 : vector<8xf32> to vector<8x1xf32>
    %9 = math.log %8 : vector<8x1xf32>
    %10 = arith.addf %3, %9 : vector<8x1xf32>
    %11 = tpu.iota {dimensions = array<i32: 1>} : vector<8x128xi32>
    %12 = vector.broadcast %1 : vector<8x1xi32> to vector<8x128xi32>
    %13 = arith.cmpi eq, %11, %12 : vector<8x128xi32>
    %cst_4 = arith.constant 0.000000e+00 : f32
    %14 = vector.broadcast %cst_4 : f32 to vector<8x128xf32>
    %15 = arith.select %13, %0, %14 : vector<8x128xi1>, vector<8x128xf32>
    %cst_5 = arith.constant dense<0.000000e+00> : vector<8xf32>
    %16 = vector.multi_reduction <add>, %15, %cst_5 [1] : vector<8x128xf32> to vector<8xf32>
    %17 = vector.shape_cast %16 : vector<8xf32> to vector<8x1xf32>
    %18 = arith.subf %10, %17 : vector<8x1xf32>
    %19 = vector.shape_cast %18 : vector<8x1xf32> to vector<1x8x1xf32>
    %cst_6 = arith.constant dense<0.000000e+00> : vector<1xf32>
    %20 = vector.multi_reduction <add>, %19, %cst_6 [1, 2] : vector<1x8x1xf32> to vector<1xf32>
    %21 = vector.shape_cast %20 : vector<1xf32> to vector<1x1x1xf32>
    %22 = vector.extract %21[0, 0, 0] : f32 from vector<1x1x1xf32>
    %23 = tpu.iota {dimensions = array<i32: 1>} : vector<1x8x128xi32>
    %24 = tpu.iota {dimensions = array<i32: 2>} : vector<1x8x128xi32>
    %c0_i32 = arith.constant 0 : i32
    %25 = vector.broadcast %c0_i32 : i32 to vector<1x8x128xi32>
    %26 = arith.cmpi eq, %23, %25 : vector<1x8x128xi32>
    %c0_i32_7 = arith.constant 0 : i32
    %27 = vector.broadcast %c0_i32_7 : i32 to vector<1x8x128xi32>
    %28 = arith.cmpi eq, %24, %27 : vector<1x8x128xi32>
    %29 = arith.andi %26, %28 : vector<1x8x128xi1>
    %cst_8 = arith.constant 0.000000e+00 : f32
    %30 = vector.broadcast %22 : f32 to vector<1x8x128xf32>
    %31 = vector.broadcast %cst_8 : f32 to vector<1x8x128xf32>
    %32 = arith.select %29, %30, %31 : vector<1x8x128xi1>, vector<1x8x128xf32>
    %c0_9 = arith.constant 0 : index
    %c0_10 = arith.constant 0 : index
    %c0_11 = arith.constant 0 : index
    %33 = vector.load %arg3[%c0_9, %c0_10, %c0_11] : memref<1x8x128xf32, #tpu.memory_space<vmem>>, vector<1x8x128xf32>
    tpu.vector_store %arg3[%c0_9, %c0_10, %c0_11], %32 {strides = array<i32>} : memref<1x8x128xf32, #tpu.memory_space<vmem>>, vector<1x8x128xf32>,
    return
  }
  func.func @transform_0(%arg0: i32) -> (i32, i32) {
    %c0_i32 = arith.constant 0 : i32
    %c0_i32_0 = arith.constant 0 : i32
    return %arg0, %c0_i32 : i32, i32
  }
  func.func @transform_1(%arg0: i32) -> (i32, i32) {
    %c0_i32 = arith.constant 0 : i32
    %c0_i32_0 = arith.constant 0 : i32
    return %arg0, %c0_i32 : i32, i32
  }
  func.func @transform_2(%arg0: i32) -> (i32, i32, i32) {
    %c0_i32 = arith.constant 0 : i32
    %c0_i32_0 = arith.constant 0 : i32
    %c0_i32_1 = arith.constant 0 : i32
    return %arg0, %c0_i32, %c0_i32_0 : i32, i32, i32
  }
}

</mosaic_0001>

<bundles_post_ra>
// kernel: tpu_custom_call.1
= control target key start
LH: loop header
LB: loop body
LE: loop exit
PB: predicated region body
PF: predicated region fallthrough
CT: control target
= control target key end

     0   :  { %7 = vsyncpa [#allocation3], 0  ;;  %s515_s0 = inlined_call_operand.vmem [shape: f32[24,128], index: 0, kind: input, shape index: {}]   ;;  %s516_s1 = inlined_call_operand.vmem [shape: s32[24,1], index: 1, kind: input, shape index: {}]   ;;  %s517_s2 = inlined_call_operand.hbm [shape: f32[3,8,128], index: 2, kind: output, shape index: {}]  }
   0x1   :  { %9 = vsyncpa [#allocation3 + $0x1], 0  ;;  %s419_s9 = smov 0   ;;  %s421_s10 = smov 0  }
   0x2   :  { %s423_s11 = smov 0   ;;  %s425_s12 = smov 0  }
   0x3 LB: > { %s440_s13 = sadd.s32 4294967295, %s400_s12   ;;  %s282_s14 = sadd.s32 4294967294, %s400_s12   ;;  %s400_s12 = sphi %s425_s12, %s523_s12   ;;  %s396_s11 = sphi %s423_s11, %s522_s11   ;;  %s392_s10 = sphi %s421_s10, %s521_s10   ;;  %s388_s9 = sphi %s419_s9, %s520_s9  }
   0x4   : > { %s444_s15 = sadd.s32 1, %s400_s12   ;;  %s74_s16 = sadd.s32 1, %s396_s11 }
   0x5   : > { %s71_s17 = ssub.s32 %s400_s12, %s444_s15  ;;  %p84_p0 = scmp.ne.s32.totalorder %s396_s11, %s392_s10 }
   0x6   : > { %p72_p1 = scmp.eq.s32.totalorder %s71_s17, 0  ;;  %p85_p2 = scmp.eq.s32.totalorder %s440_s13, 2 }
   0x7   : > { %p90_p3 = scmp.ne.s32.totalorder %s392_s10, %s388_s9  ;;  %p91_p4 = scmp.eq.s32.totalorder %s282_s14, 2 }
   0x8   : > { %s455_s18 = scalar_select %p72_p1, %s396_s11, %s74_s16  }
   0x9   : > { %p457_p5 = por %p85_p2, %p84_p0  ;;  %p461_p6 = por %p91_p4, %p90_p3 }
   0xa   : > { %p285_p7 = scmp.ge.s32.totalorder %s400_s12, 1  ;;  %p123_p8 = scmp.lt.s32.totalorder %s400_s12, 4 }
   0xc   : > { %p124_p9 = pnand %p285_p7, %p123_p8 }
   0xd   : > { %p148_p10 = scmp.lt.s32.totalorder (!%p124_p9), %s440_s13, 2  ;;  %s145_s29 = sand.u32 (!%p124_p9), 1, %s392_s10  }
   0xe   : > { %127 = sbr.rel (%p124_p9) target bundleno = 554 (0x22a), region = 28  ;;  %s286_s30 = sshll.u32 (!%p124_p9), %s145_s29, 3 }
   0xf   : > { %s290_s3 = sshll.u32 (!%p124_p9), %s440_s13, 7  ;;  %s147_s4 = scalar_lea.vmem (!%p124_p9), [#allocation2], %s286_s30 }
  0x10   : > { %s211_s5 = sshll.u32 (!%p124_p9), %s147_s4, 4  ;;  %s480_s14 = scalar_lea.hbm (!%p124_p9), %s517_s2, %s290_s3  ;;  %s212_s5 = int_to_ptr.vmem [resolvable:$true] %s211_s5 }
  0x11   : > { %s198_s16 = scalar_lea.sflag (!%p124_p9), [#allocation3], %s145_s29  ;;  %s340_s17 = scalar_lea.vmem (!%p124_p9), %s212_s5, 128 }
  0x12   : > { %p341_p11 = scmp.ne.s32.totalorder (!%p124_p9), %s212_s5, %s340_s17 }
  0x13   : > { %v402_v0 = vmov 0   ;;  %s149_s21 = scalar_select %p148_p10, %s440_s13, 2  ;;  %v168_v6 = vlaneseq  ;;  %vm178_vm1 = vcmask 7168  }
  0x14   : > { %335 = vset.pattern.permute.xlu0 %v402_v0  ;;  %p342_p12 = pnand %p341_p11, %p457_p5  ;;  %s403_s13 = smov [#allocation2]  }
  0x15   : > { %s287_s22 = sshll.u32 %s149_s21, 3  ;;  %v169_v7 = vand.u32 127, %v168_v6  ;;  %v190_v25 = vshrl.u32 %v168_v6, 7  ;;  %s344_s21 = sshll.u32 %s403_s13, 4  ;;  %s345_s21 = int_to_ptr.vmem [resolvable:$false] %s344_s21 }
  0x16   : > { %s151_s25 = scalar_lea.vmem %s515_s0, %s287_s22  ;;  %s155_s28 = scalar_lea.vmem %s516_s1, %s287_s22 }
  0x17   : > { %v156_v1 = vld [vmem:[%s151_s25] sm:$0xff]  ;;  %vm191_vm2 = vcmp.eq.s32.totalorder %v190_v25, 0  ;;  %vm192_vm3 = vcmp.eq.s32.totalorder %v169_v7, 0  ;;  %p343_p13 = pneg %p342_p12  ;;  %s346_s22 = scalar_lea.vmem %s345_s21, 256 }
  0x18   : > { %158 = vmax.xlane.f32.xlu0 %v156_v1  ;;  %v157_v2 = vld [vmem:[%s155_s28] sm:$0xff]  ;;  %vm193_vm4 = vmand %vm191_vm2, %vm192_vm3  ;;  %p347_p0 = scmp.lt.s32.totalorder %s212_s5, %s345_s21  ;;  %p348_p1 = scmp.lt.s32.totalorder %s346_s22, %s340_s17 }
  0x1a   : > { %p349_p2 = por %p348_p1, %p347_p0 }
  0x1c   : > { %p350_p3 = pnand %p349_p2, %p343_p13 }
  0x2e   : > { %171 = vperm.xlu0 %335, %v157_v2  }
  0xa1   : > { %v159_v3 = vpop.xlane.xlu0 %158 }
  0xa2   : > { %v160_v4 = vsub.f32 %v156_v1, %v159_v3 }
  0xa4   : > { %v161_v5 = vmul.f32 1.442695, %v160_v4 }
  0xa6   : > { %336 = vpow2.f32 %v161_v5 }
  0xa9   : > { %v172_v8 = vpop.permute.xlu0 %171 }
  0xaa   : > { %vm173_vm0 = vcmp.eq.s32.totalorder %v169_v7, %v172_v8 }
  0xab   : > { %v174_v10 = vsel %vm173_vm0, %v156_v1, 0.0 }
  0xb3   : > { %v337_v9 = vpop.eup %336 }
  0xb4   : > { %163 = vadd.xlane.f32.xlu1 %v337_v9 }
  0xb8   : > { %175 = vadd.xlane.f32.xlu1 %v174_v10 }
 0x13d   : > { %v164_v11 = vpop.xlane.xlu1 %163 }
 0x13e   : > { %338 = vlog2.f32 %v164_v11 }
 0x141   : > { %v176_v14 = vpop.xlane.xlu1 %175 }
 0x14b   : > { %v339_v12 = vpop.eup %338 }
 0x14c   : > { %v166_v13 = vmul.f32 0.6931472, %v339_v12 }
 0x14e   : > { %v167_v15 = vadd.f32 %v166_v13, %v159_v3 }
 0x150   : > { %v177_v16 = vsub.f32 %v167_v15, %v176_v14 }
 0x152   : > { %v179_v17 = vsel %vm178_vm1, %v177_v16, 0.0 }
 0x153   : > { %180 = vadd.xlane.f32.xlu1 %v179_v17 }
 0x1dc   : > { %v181_v18 = vpop.xlane.xlu1 %180 }
 0x1dd   : > { %v182_v19 = vrot.slane %v181_v18, 4 }
 0x1df   : > { %v183_v20 = vadd.f32 %v182_v19, %v181_v18 }
 0x1e1   : > { %v184_v21 = vrot.slane %v183_v20, 2 }
 0x1e3   : > { %v185_v22 = vadd.f32 %v184_v21, %v183_v20 }
 0x1e5   : > { %v186_v23 = vrot.slane %v185_v22, 1 }
 0x1e7   : > { %v187_v24 = vadd.f32 %v186_v23, %v185_v22 }
 0x1e9   : > { %293 = vpush %v187_v24 }
 0x21a   : > { %s294_s6 = spop %293 }
 0x21b   : > { %v194_v26 = vstv %s294_s6 }
 0x21c   : > { %v195_v27 = vsel %vm193_vm4, %v194_v26, 0.0 }
 0x21d   : > { %196 = vst [vmem:[%s147_s4] sm:$0xff] %v195_v27 }
 0x21e   : > { %353 = shalt.err (!%p350_p3)
}
 0x21f   : > { %s354_s23 = scalar_lea.hbm %s480_s14, 128  ;;  %s358_s26 = scalar_lea.hbm %s517_s2, 384 }
 0x220   : > { %p355_p4 = scmp.ne.s32.totalorder %s480_s14, %s354_s23  ;;  %p359_p9 = scmp.lt.s32.totalorder %s480_s14, %s517_s2 }
 0x221   : > { %p360_p10 = scmp.lt.s32.totalorder %s358_s26, %s354_s23 }
 0x222   : > { %p356_p7 = pnand %p355_p4, %p457_p5 }
 0x223   : > { %p361_p11 = por %p360_p10, %p359_p9 }
 0x224   : > { %p357_p8 = pneg %p356_p7 }
 0x226   : > { %p362_p12 = pnand %p361_p11, %p357_p8 }
 0x228   : > { %365 = shalt.err (!%p362_p12)
}
 0x229   : > { %295 = dma.vmem_to_hbm [thread:$0]  (%p457_p5), %s212_s5, 128, %s480_s14, %s198_s16  }
 0x22a PF: > { %p301_p13 = scmp.ge.s32.totalorder %s400_s12, 2  ;;  %s223_s29 = sand.u32 1, %s388_s9  }
 0x22b   : > { %s224_s30 = scalar_lea.sflag [#allocation3], %s223_s29 }
 0x22c   : > { %p298_p0 = pnand %p301_p13, %p461_p6 }
 0x22e   : > { %p299_p1 = pneg %p298_p0 }
 0x230   : > { %383 = dma.done.wait (%p299_p1), %s224_s30, 128  }
 0x231   : > { %385 = vsyncadd (%p299_p1), %s224_s30, 4294967168  ;;  %p12_p2 = scmp.ge.s32.totalorder %s444_s15, 5   ;;  %s520_s9 = smov %s392_s10 }
 0x232   : > { %s521_s10 = smov %s396_s11  ;;  %s522_s11 = smov %s455_s18 }
 0x233   : > { %s523_s12 = smov %s444_s15  ;;  %14 = sbr.rel (!%p12_p2) target bundleno = 3 (0x3), region = 66 }
 0x238   :  { %229 = vsyncpa [#allocation3], 1 }
 0x239   :  { %231 = vsyncpa [#allocation3 + $0x1], 1 }

</bundles_post_ra>
